<compile_context>
chip_gen: v5e
topology: v5e:2x2
jax: 0.10.0
libtpu: 0.0.40
codegen_flags: <defaults>
</compile_context>

<pallas_src>
import functools

import jax
import jax.numpy as jnp
from jax import lax
from jax.experimental import pallas as pl
from jax.experimental.pallas import tpu as pltpu


def _round_up(x, n):
    return ((x + n - 1) // n) * n


def _alm_kernel(x_ref, pred_ref, tgt_ref, at_ref, bt_ref, bvec_ref,
                sumc_ref, sumc2_ref, sumd2_ref,
                *, n_rows, block_rows, tiles_per_core, need_mask):
    i = pl.program_id(1)

    @pl.when(i == 0)
    def _init():
        sumc_ref[...] = jnp.zeros_like(sumc_ref)
        sumc2_ref[...] = jnp.zeros_like(sumc2_ref)
        sumd2_ref[...] = jnp.zeros_like(sumd2_ref)

    x = x_ref[...]                                     # (T, dx)   stream dtype
    pred = pred_ref[...]                               # (T, dp)   stream dtype
    diff = pred.astype(jnp.float32) - tgt_ref[...].astype(jnp.float32)

    # c^T tile = X A^T + pred B^T - b  -> (T, m_pad), f32 accumulation on MXU.
    cT = (jnp.dot(x, at_ref[...], preferred_element_type=jnp.float32)
          + jnp.dot(pred, bt_ref[...], preferred_element_type=jnp.float32)
          - bvec_ref[...])

    if need_mask:
        tile_idx = pl.program_id(0) * tiles_per_core + i
        row0 = tile_idx * block_rows
        rows = row0 + lax.broadcasted_iota(jnp.int32, (block_rows, 1), 0)
        valid = rows < n_rows
        cT = jnp.where(valid, cT, 0.0)
        diff = jnp.where(valid, diff, 0.0)

    # Running row-sums only (cheap sublane reduce); lane work deferred to epilogue.
    sumc_ref[...] += jnp.sum(cT, axis=0)[None, None, :]
    sumc2_ref[...] += jnp.sum(cT * cT, axis=0)[None, None, :]
    sumd2_ref[...] += jnp.sum(diff * diff, axis=0)[None, None, :]


def make_alm_loss(A, B, b, *, block_rows=512, num_cores=2, stream_dtype=None):
    """Precompute (hoist) padded A^T / B^T / b once; return a jitted loss fn."""
    A = jnp.asarray(A)
    B = jnp.asarray(B)
    b = jnp.asarray(b)
    m, dx = A.shape
    _, dp = B.shape
    dtype = stream_dtype if stream_dtype is not None else jnp.float32
    m_pad = _round_up(m, 128)                          # full-lane, unmasked stores

    A_T = jnp.zeros((dx, m_pad), dtype).at[:, :m].set(A.T.astype(dtype))
    B_T = jnp.zeros((dp, m_pad), dtype).at[:, :m].set(B.T.astype(dtype))
    b_row = jnp.zeros((1, m_pad), jnp.float32).at[:, :m].set(
        b.reshape(1, m).astype(jnp.float32))

    @jax.jit
    def loss_fn(X, pred, target, lambda_k, mu_k):
        N = X.shape[0]
        Xs = X.astype(dtype)
        ps = pred.astype(dtype)
        ts = target.astype(dtype)

        # Row-tile size: as big as possible but safely inside the default
        # scoped-VMEM budget after double-buffering the 3 streamed inputs
        # (16 MiB on v5e, 32 MiB on v6e/v7x -> target ~8 MiB of stream buffers).
        itemsize = jnp.dtype(dtype).itemsize
        bytes_per_row = (dx + 2 * dp) * itemsize
        t_cap = max(8, (8 * 1024 * 1024) // (2 * bytes_per_row))
        T = min(block_rows, t_cap, N)
        if T < N:
            T = max(8, (T // 8) * 8)                   # multiple of 8 unless full

        total_tiles = pl.cdiv(N, T)
        nc = max(1, min(num_cores, total_tiles))       # split rows across TCs (v7x)
        tiles_per_core = pl.cdiv(total_tiles, nc)
        need_mask = (N % T != 0) or (nc * tiles_per_core != total_tiles)

        def stream_map(c, i):
            # Clamp so over-assigned tiles re-fetch the last real tile
            # (their contribution is zeroed by the in-kernel row mask).
            return (jnp.minimum(c * tiles_per_core + i, total_tiles - 1), 0)

        def fixed_map(c, i):
            return (0, 0)

        def out_map(c, i):
            return (c, 0, 0)

        kernel = functools.partial(
            _alm_kernel, n_rows=N, block_rows=T,
            tiles_per_core=tiles_per_core, need_mask=need_mask)

        grid_spec = pltpu.PrefetchScalarGridSpec(
            num_scalar_prefetch=0,
            grid=(nc, tiles_per_core),
            in_specs=[
                pl.BlockSpec((T, dx), stream_map),      # X tile
                pl.BlockSpec((T, dp), stream_map),      # pred tile
                pl.BlockSpec((T, dp), stream_map),      # target tile
                pl.BlockSpec((dx, m_pad), fixed_map),   # A^T (resident)
                pl.BlockSpec((dp, m_pad), fixed_map),   # B^T (resident)
                pl.BlockSpec((1, m_pad), fixed_map),    # b row (resident)
            ],
            out_specs=[
                pl.BlockSpec((1, 1, m_pad), out_map),   # sum over rows of c
                pl.BlockSpec((1, 1, m_pad), out_map),   # sum over rows of c^2
                pl.BlockSpec((1, 1, dp), out_map),      # sum over rows of diff^2
            ],
        )

        sumc, sumc2, sumd2 = pl.pallas_call(
            kernel,
            out_shape=(
                jax.ShapeDtypeStruct((nc, 1, m_pad), jnp.float32),
                jax.ShapeDtypeStruct((nc, 1, m_pad), jnp.float32),
                jax.ShapeDtypeStruct((nc, 1, dp), jnp.float32),
            ),
            grid_spec=grid_spec,
            compiler_params=pltpu.CompilerParams(
                dimension_semantics=("parallel", "arbitrary")),
        )(Xs, ps, ts, A_T, B_T, b_row)

        # Tiny epilogue in plain JAX: combine per-core partials, lane-reduce,
        # dot with lambda_k, and apply the /N, /(N*m), mu/2 normalizations once.
        sumc_t = jnp.sum(sumc[:, 0, :m], axis=0)        # (m,)
        sumc2_t = jnp.sum(sumc2[:, 0, :], axis=0)       # (m_pad,), padded cols = 0
        sumd2_t = jnp.sum(sumd2[:, 0, :], axis=0)       # (dp,)

        mse = jnp.sum(sumd2_t) / (N * dp)
        lambda_c = jnp.dot(lambda_k.astype(jnp.float32), sumc_t) / N
        mu_c = jnp.asarray(mu_k, jnp.float32) * 0.5 * jnp.sum(sumc2_t) / (N * m)
        return mse, lambda_c + mu_c

    return loss_fn


def alm_loss_ref(X, pred, target, lambda_k, mu_k, A, B, b):
    """Plain-JAX reference mirroring the PyTorch forward exactly."""
    mse = jnp.mean((pred - target) ** 2)
    c = A @ X.T + B @ pred.T - jnp.tile(b, (1, X.shape[0]))   # (m, N)
    lambda_c = jnp.mean(lambda_k[None, :] @ c)
    mu_c = mu_k / 2.0 * jnp.mean(c ** 2)
    return mse, lambda_c + mu_c


if __name__ == "__main__":
    key = jax.random.PRNGKey(0)
    kA, kB, kb, kX, kp, kt, kl = jax.random.split(key, 7)

    # Small shapes consistent with the module's forward.
    N, dx, dp, m = 24, 32, 16, 8

    # "Module parameters" (A, B, b from __init__).
    A = jax.random.normal(kA, (m, dx), jnp.float32)
    B = jax.random.normal(kB, (m, dp), jnp.float32)
    b = jax.random.normal(kb, (m, 1), jnp.float32)

    # Forward inputs.
    X = jax.random.normal(kX, (N, dx), jnp.float32)
    pred = jax.random.normal(kp, (N, dp), jnp.float32)
    target = jax.random.normal(kt, (N, dp), jnp.float32)
    lambda_k = jax.random.normal(kl, (m,), jnp.float32)
    mu_k = jnp.float32(0.5)

    # Small block_rows so the test exercises the grid, the uneven-tile mask and
    # the 2-way core split (3 real tiles over a (2, 2) grid).
    loss_fn = make_alm_loss(A, B, b, block_rows=8, num_cores=2)

    mse_k, alm_k = loss_fn(X, pred, target, lambda_k, mu_k)
    jax.block_until_ready((mse_k, alm_k))

    mse_r, alm_r = alm_loss_ref(X, pred, target, lambda_k, mu_k, A, B, b)

    assert jnp.allclose(mse_k, mse_r, rtol=1e-5, atol=1e-5), (mse_k, mse_r)
    assert jnp.allclose(alm_k, alm_r, rtol=1e-5, atol=1e-5), (alm_k, alm_r)
    print("KERNEL_OK")
</pallas_src>

<mosaic_0001>
module attributes {stable_mosaic.version = 11 : i64} {
  func.func @_alm_kernel(%arg0: i32, %arg1: i32, %arg2: memref<8x32xf32, #tpu.memory_space<vmem>>, %arg3: memref<8x16xf32, #tpu.memory_space<vmem>>, %arg4: memref<8x16xf32, #tpu.memory_space<vmem>>, %arg5: memref<32x128xf32, #tpu.memory_space<vmem>>, %arg6: memref<16x128xf32, #tpu.memory_space<vmem>>, %arg7: memref<1x128xf32, #tpu.memory_space<vmem>>, %arg8: memref<1x1x128xf32, #tpu.memory_space<vmem>>, %arg9: memref<1x1x128xf32, #tpu.memory_space<vmem>>, %arg10: memref<1x1x16xf32, #tpu.memory_space<vmem>>) attributes {dimension_semantics = [#tpu.dimension_semantics<parallel>, #tpu.dimension_semantics<arbitrary>], iteration_bounds = array<i64: 2, 2>, scalar_prefetch = 0 : i64, scratch_operands = 0 : i64, tpu.core_type = #tpu.core_type<tc>, window_params = [{transform_indices = @transform_0, window_bounds = array<i64: 8, 32>}, {transform_indices = @transform_1, window_bounds = array<i64: 8, 16>}, {transform_indices = @transform_2, window_bounds = array<i64: 8, 16>}, {pipeline_mode = #tpu.pipeline_mode<synchronous>, transform_indices = @transform_3, window_bounds = array<i64: 32, 128>}, {pipeline_mode = #tpu.pipeline_mode<synchronous>, transform_indices = @transform_4, window_bounds = array<i64: 16, 128>}, {pipeline_mode = #tpu.pipeline_mode<synchronous>, transform_indices = @transform_5, window_bounds = array<i64: 1, 128>}, {transform_indices = @transform_6, window_bounds = array<i64: 1, 1, 128>}, {transform_indices = @transform_7, window_bounds = array<i64: 1, 1, 128>}, {transform_indices = @transform_8, window_bounds = array<i64: 1, 1, 16>}]} {
    %c0_i32 = arith.constant 0 : i32
    %0 = arith.cmpi eq, %arg1, %c0_i32 : i32
    %1 = arith.extui %0 : i1 to i32
    %c0_i32_0 = arith.constant 0 : i32
    %2 = arith.cmpi ne, %1, %c0_i32_0 : i32
    scf.if %2 {
      %cst_36 = arith.constant 0.000000e+00 : f32
      %48 = vector.broadcast %cst_36 : f32 to vector<1x1x128xf32>
      %c0_37 = arith.constant 0 : index
      %c0_38 = arith.constant 0 : index
      %c0_39 = arith.constant 0 : index
      %49 = vector.load %arg8[%c0_37, %c0_38, %c0_39] : memref<1x1x128xf32, #tpu.memory_space<vmem>>, vector<1x1x128xf32>
      tpu.vector_store %arg8[%c0_37, %c0_38, %c0_39], %48 {strides = array<i32>} : memref<1x1x128xf32, #tpu.memory_space<vmem>>, vector<1x1x128xf32>,
      %cst_40 = arith.constant 0.000000e+00 : f32
      %50 = vector.broadcast %cst_40 : f32 to vector<1x1x128xf32>
      %c0_41 = arith.constant 0 : index
      %c0_42 = arith.constant 0 : index
      %c0_43 = arith.constant 0 : index
      %51 = vector.load %arg9[%c0_41, %c0_42, %c0_43] : memref<1x1x128xf32, #tpu.memory_space<vmem>>, vector<1x1x128xf32>
      tpu.vector_store %arg9[%c0_41, %c0_42, %c0_43], %50 {strides = array<i32>} : memref<1x1x128xf32, #tpu.memory_space<vmem>>, vector<1x1x128xf32>,
      %cst_44 = arith.constant 0.000000e+00 : f32
      %52 = vector.broadcast %cst_44 : f32 to vector<1x1x16xf32>
      %c0_45 = arith.constant 0 : index
      %c0_46 = arith.constant 0 : index
      %c0_47 = arith.constant 0 : index
      %53 = vector.load %arg10[%c0_45, %c0_46, %c0_47] : memref<1x1x16xf32, #tpu.memory_space<vmem>>, vector<1x1x16xf32>
      tpu.vector_store %arg10[%c0_45, %c0_46, %c0_47], %52 {strides = array<i32>} : memref<1x1x16xf32, #tpu.memory_space<vmem>>, vector<1x1x16xf32>,
    } else {
    }
    %c0 = arith.constant 0 : index
    %c0_1 = arith.constant 0 : index
    %3 = vector.load %arg2[%c0, %c0_1] : memref<8x32xf32, #tpu.memory_space<vmem>>, vector<8x32xf32>
    %c0_2 = arith.constant 0 : index
    %c0_3 = arith.constant 0 : index
    %4 = vector.load %arg3[%c0_2, %c0_3] : memref<8x16xf32, #tpu.memory_space<vmem>>, vector<8x16xf32>
    %c0_4 = arith.constant 0 : index
    %c0_5 = arith.constant 0 : index
    %5 = vector.load %arg4[%c0_4, %c0_5] : memref<8x16xf32, #tpu.memory_space<vmem>>, vector<8x16xf32>
    %6 = arith.subf %4, %5 : vector<8x16xf32>
    %c0_6 = arith.constant 0 : index
    %c0_7 = arith.constant 0 : index
    %7 = vector.load %arg5[%c0_6, %c0_7] : memref<32x128xf32, #tpu.memory_space<vmem>>, vector<32x128xf32>
    %cst = arith.constant dense<0.000000e+00> : vector<8x128xf32>
    %8 = tpu.matmul %3, %7, %cst {dimension_numbers = #tpu.dot_dimension_numbers<[1], [0], [0], [1], [0, 0, 1, 1], [], []>} : vector<8x32xf32>, vector<32x128xf32>, vector<8x128xf32> -> vector<8x128xf32>
    %c0_8 = arith.constant 0 : index
    %c0_9 = arith.constant 0 : index
    %9 = vector.load %arg6[%c0_8, %c0_9] : memref<16x128xf32, #tpu.memory_space<vmem>>, vector<16x128xf32>
    %cst_10 = arith.constant dense<0.000000e+00> : vector<8x128xf32>
    %10 = tpu.matmul %4, %9, %cst_10 {dimension_numbers = #tpu.dot_dimension_numbers<[1], [0], [0], [1], [0, 0, 1, 1], [], []>} : vector<8x16xf32>, vector<16x128xf32>, vector<8x128xf32> -> vector<8x128xf32>
    %11 = arith.addf %8, %10 : vector<8x128xf32>
    %c0_11 = arith.constant 0 : index
    %c0_12 = arith.constant 0 : index
    %12 = vector.load %arg7[%c0_11, %c0_12] : memref<1x128xf32, #tpu.memory_space<vmem>>, vector<1x128xf32>
    %13 = vector.broadcast %12 : vector<1x128xf32> to vector<8x128xf32>
    %14 = arith.subf %11, %13 : vector<8x128xf32>
    %c2_i32 = arith.constant 2 : i32
    %15 = arith.muli %arg0, %c2_i32 : i32
    %16 = arith.addi %15, %arg1 : i32
    %c8_i32 = arith.constant 8 : i32
    %17 = arith.muli %16, %c8_i32 : i32
    %18 = tpu.iota {dimensions = array<i32: 0>} : vector<8x1xi32>
    %19 = vector.broadcast %17 : i32 to vector<8x1xi32>
    %20 = arith.addi %19, %18 : vector<8x1xi32>
    %c24_i32 = arith.constant 24 : i32
    %21 = vector.broadcast %c24_i32 : i32 to vector<8x1xi32>
    %22 = arith.cmpi slt, %20, %21 : vector<8x1xi32>
    %cst_13 = arith.constant 0.000000e+00 : f32
    %23 = vector.shape_cast %22 : vector<8x1xi1> to vector<8x1xi1>
    %24 = vector.broadcast %23 : vector<8x1xi1> to vector<8x128xi1>
    %25 = vector.broadcast %cst_13 : f32 to vector<8x128xf32>
    %26 = arith.select %24, %14, %25 : vector<8x128xi1>, vector<8x128xf32>
    %cst_14 = arith.constant 0.000000e+00 : f32
    %27 = vector.shape_cast %22 : vector<8x1xi1> to vector<8x1xi1>
    %28 = vector.broadcast %27 : vector<8x1xi1> to vector<8x16xi1>
    %29 = vector.broadcast %cst_14 : f32 to vector<8x16xf32>
    %30 = arith.select %28, %6, %29 : vector<8x16xi1>, vector<8x16xf32>
    %c0_15 = arith.constant 0 : index
    %c0_16 = arith.constant 0 : index
    %c0_17 = arith.constant 0 : index
    %31 = vector.load %arg8[%c0_15, %c0_16, %c0_17] : memref<1x1x128xf32, #tpu.memory_space<vmem>>, vector<1x1x128xf32>
    %cst_18 = arith.constant dense<0.000000e+00> : vector<128xf32>
    %32 = vector.multi_reduction <add>, %26, %cst_18 [0] : vector<8x128xf32> to vector<128xf32>
    %33 = vector.shape_cast %32 : vector<128xf32> to vector<1x1x128xf32>
    %34 = arith.addf %31, %33 : vector<1x1x128xf32>
    %c0_19 = arith.constant 0 : index
    %c0_20 = arith.constant 0 : index
    %c0_21 = arith.constant 0 : index
    %35 = vector.load %arg8[%c0_19, %c0_20, %c0_21] : memref<1x1x128xf32, #tpu.memory_space<vmem>>, vector<1x1x128xf32>
    tpu.vector_store %arg8[%c0_19, %c0_20, %c0_21], %34 {strides = array<i32>} : memref<1x1x128xf32, #tpu.memory_space<vmem>>, vector<1x1x128xf32>,
    %c0_22 = arith.constant 0 : index
    %c0_23 = arith.constant 0 : index
    %c0_24 = arith.constant 0 : index
    %36 = vector.load %arg9[%c0_22, %c0_23, %c0_24] : memref<1x1x128xf32, #tpu.memory_space<vmem>>, vector<1x1x128xf32>
    %37 = arith.mulf %26, %26 : vector<8x128xf32>
    %cst_25 = arith.constant dense<0.000000e+00> : vector<128xf32>
    %38 = vector.multi_reduction <add>, %37, %cst_25 [0] : vector<8x128xf32> to vector<128xf32>
    %39 = vector.shape_cast %38 : vector<128xf32> to vector<1x1x128xf32>
    %40 = arith.addf %36, %39 : vector<1x1x128xf32>
    %c0_26 = arith.constant 0 : index
    %c0_27 = arith.constant 0 : index
    %c0_28 = arith.constant 0 : index
    %41 = vector.load %arg9[%c0_26, %c0_27, %c0_28] : memref<1x1x128xf32, #tpu.memory_space<vmem>>, vector<1x1x128xf32>
    tpu.vector_store %arg9[%c0_26, %c0_27, %c0_28], %40 {strides = array<i32>} : memref<1x1x128xf32, #tpu.memory_space<vmem>>, vector<1x1x128xf32>,
    %c0_29 = arith.constant 0 : index
    %c0_30 = arith.constant 0 : index
    %c0_31 = arith.constant 0 : index
    %42 = vector.load %arg10[%c0_29, %c0_30, %c0_31] : memref<1x1x16xf32, #tpu.memory_space<vmem>>, vector<1x1x16xf32>
    %43 = arith.mulf %30, %30 : vector<8x16xf32>
    %cst_32 = arith.constant dense<0.000000e+00> : vector<16xf32>
    %44 = vector.multi_reduction <add>, %43, %cst_32 [0] : vector<8x16xf32> to vector<16xf32>
    %45 = vector.shape_cast %44 : vector<16xf32> to vector<1x1x16xf32>
    %46 = arith.addf %42, %45 : vector<1x1x16xf32>
    %c0_33 = arith.constant 0 : index
    %c0_34 = arith.constant 0 : index
    %c0_35 = arith.constant 0 : index
    %47 = vector.load %arg10[%c0_33, %c0_34, %c0_35] : memref<1x1x16xf32, #tpu.memory_space<vmem>>, vector<1x1x16xf32>
    tpu.vector_store %arg10[%c0_33, %c0_34, %c0_35], %46 {strides = array<i32>} : memref<1x1x16xf32, #tpu.memory_space<vmem>>, vector<1x1x16xf32>,
    return
  }
  func.func @transform_0(%arg0: i32, %arg1: i32) -> (i32, i32) {
    %c2_i32 = arith.constant 2 : i32
    %0 = arith.muli %arg0, %c2_i32 : i32
    %1 = arith.addi %0, %arg1 : i32
    %c2_i32_0 = arith.constant 2 : i32
    %2 = arith.minsi %1, %c2_i32_0 : i32
    %c0_i32 = arith.constant 0 : i32
    %c0_i32_1 = arith.constant 0 : i32
    return %2, %c0_i32 : i32, i32
  }
  func.func @transform_1(%arg0: i32, %arg1: i32) -> (i32, i32) {
    %c2_i32 = arith.constant 2 : i32
    %0 = arith.muli %arg0, %c2_i32 : i32
    %1 = arith.addi %0, %arg1 : i32
    %c2_i32_0 = arith.constant 2 : i32
    %2 = arith.minsi %1, %c2_i32_0 : i32
    %c0_i32 = arith.constant 0 : i32
    %c0_i32_1 = arith.constant 0 : i32
    return %2, %c0_i32 : i32, i32
  }
  func.func @transform_2(%arg0: i32, %arg1: i32) -> (i32, i32) {
    %c2_i32 = arith.constant 2 : i32
    %0 = arith.muli %arg0, %c2_i32 : i32
    %1 = arith.addi %0, %arg1 : i32
    %c2_i32_0 = arith.constant 2 : i32
    %2 = arith.minsi %1, %c2_i32_0 : i32
    %c0_i32 = arith.constant 0 : i32
    %c0_i32_1 = arith.constant 0 : i32
    return %2, %c0_i32 : i32, i32
  }
  func.func @transform_3(%arg0: i32, %arg1: i32) -> (i32, i32) {
    %c0_i32 = arith.constant 0 : i32
    %c0_i32_0 = arith.constant 0 : i32
    %c0_i32_1 = arith.constant 0 : i32
    return %c0_i32, %c0_i32_0 : i32, i32
  }
  func.func @transform_4(%arg0: i32, %arg1: i32) -> (i32, i32) {
    %c0_i32 = arith.constant 0 : i32
    %c0_i32_0 = arith.constant 0 : i32
    %c0_i32_1 = arith.constant 0 : i32
    return %c0_i32, %c0_i32_0 : i32, i32
  }
  func.func @transform_5(%arg0: i32, %arg1: i32) -> (i32, i32) {
    %c0_i32 = arith.constant 0 : i32
    %c0_i32_0 = arith.constant 0 : i32
    %c0_i32_1 = arith.constant 0 : i32
    return %c0_i32, %c0_i32_0 : i32, i32
  }
  func.func @transform_6(%arg0: i32, %arg1: i32) -> (i32, i32, i32) {
    %c0_i32 = arith.constant 0 : i32
    %c0_i32_0 = arith.constant 0 : i32
    %c0_i32_1 = arith.constant 0 : i32
    return %arg0, %c0_i32, %c0_i32_0 : i32, i32, i32
  }
  func.func @transform_7(%arg0: i32, %arg1: i32) -> (i32, i32, i32) {
    %c0_i32 = arith.constant 0 : i32
    %c0_i32_0 = arith.constant 0 : i32
    %c0_i32_1 = arith.constant 0 : i32
    return %arg0, %c0_i32, %c0_i32_0 : i32, i32, i32
  }
  func.func @transform_8(%arg0: i32, %arg1: i32) -> (i32, i32, i32) {
    %c0_i32 = arith.constant 0 : i32
    %c0_i32_0 = arith.constant 0 : i32
    %c0_i32_1 = arith.constant 0 : i32
    return %arg0, %c0_i32, %c0_i32_0 : i32, i32, i32
  }
}

</mosaic_0001>

<bundles_post_ra>
// kernel: loss_fn.1
= control target key start
LH: loop header
LB: loop body
LE: loop exit
PB: predicated region body
PF: predicated region fallthrough
CT: control target
= control target key end

     0   :  { %s853_s27 = smov 0   ;;  %s855_s28 = smov 0   ;;  %s975_s0 = inlined_call_operand.vmem [shape: f32[24,32], index: 0, kind: input, shape index: {}]   ;;  %s976_s1 = inlined_call_operand.vmem [shape: f32[24,16], index: 1, kind: input, shape index: {}]   ;;  %s977_s2 = inlined_call_operand.vmem [shape: f32[24,16], index: 2, kind: input, shape index: {}]   ;;  %s978_s3 = inlined_call_operand.vmem [shape: f32[32,128], index: 3, kind: input, shape index: {}]   ;;  %s979_s4 = inlined_call_operand.vmem [shape: f32[16,128], index: 4, kind: input, shape index: {}]   ;;  %s980_s5 = inlined_call_operand.vmem [shape: f32[1,128], index: 5, kind: input, shape index: {}]   ;;  %s981_s6 = inlined_call_operand.vmem [shape: f32[2,1,128], index: 6, kind: output, shape index: {0}]   ;;  %s982_s7 = inlined_call_operand.vmem [shape: f32[2,1,128], index: 7, kind: output, shape index: {1}]   ;;  %s983_s8 = inlined_call_operand.vmem [shape: f32[2,1,16], index: 8, kind: output, shape index: {2}]  }
   0x1   :  { %984 = sst [smem:[#allocation2_spill]] %s981_s6  ;;  %s857_s29 = smov 0  }
   0x2   :  { %985 = sst [smem:[#allocation3_spill]] %s982_s7  ;;  %s859_s30 = smov 0  }
   0x3   :  { %s861_s9 = smov 0  }
   0x4 LB: > { %s28_s10 = sadd.s32 1, %s797_s29  ;;  %s31_s11 = sadd.s32 1, %s801_s30  ;;  %s805_s9 = sphi %s861_s9, %s19_s9   ;;  %s801_s30 = sphi %s859_s30, %s991_s30   ;;  %s797_s29 = sphi %s857_s29, %s990_s29   ;;  %s793_s28 = sphi %s855_s28, %s989_s28   ;;  %s789_s27 = sphi %s853_s27, %s988_s27  }
   0x5   : > { %p29_p0 = scmp.ge.s32.totalorder %s28_s10, 2  ;;  %p702_p1 = scmp.ge.s32.totalorder %s805_s9, 1 }
   0x6   : > { %p344_p2 = scmp.lt.s32.totalorder %s805_s9, 5 }
   0x7   : > { %s993_s10 = smov (%p29_p0, %s28_s10), 0  ;;  %s995_s11 = smov (!%p29_p0, %s31_s11), %s801_s30 }
   0x8   : > { %p345_p3 = pnand %p702_p1, %p344_p2  ;;  %p33_p4 = scmp.ge.s32.totalorder %s995_s11, 2 }
   0x9   : > { %s703_s12 = sshll.u32 (!%p345_p3), %s793_s28, 1  ;;  %p437_p5 = scmp.lt.s32.totalorder (!%p345_p3), %s793_s28, 1 }
   0xa   : > { %s997_s11 = smov (%p33_p4, %s995_s11), 0  ;;  %348 = sbr.rel (%p345_p3) target bundleno = 184 (0xb8), region = 44 }
   0xb   : > { %s886_s13 = sadd.s32 (!%p345_p3), %s789_s27, %s703_s12  ;;  %s986_s6 = sld [smem:[#allocation2_spill]] (!%p345_p3) }
   0xc   : > { %p403_p6 = scmp.lt.s32.totalorder (!%p345_p3), %s886_s13, 2  ;;  %s987_s7 = sld [smem:[#allocation3_spill]] (!%p345_p3) }
   0xd   : > { %p718_p7 = scmp.ne.s32.totalorder (!%p345_p3), %s789_s27, 0 }
   0xf   : > { %s999_s28 = smov (!%p437_p5, %s793_s28), 1 }
  0x10   : > { %s404_s14 = scalar_select %p403_p6, %s886_s13, 2 }
  0x11   : > { %s893_s17 = scalar_lea.vmem %s986_s6, %s999_s28  ;;  %s903_s23 = scalar_lea.vmem %s983_s8, %s999_s28 }
  0x12   : > { %s898_s20 = scalar_lea.vmem %s987_s7, %s999_s28  ;;  %s1001_s14 = smov (!%p403_p6, %s404_s14), 2 }
  0x13   : > { %s905_s24 = sshll.u32 %s1001_s14, 3  ;;  %449 = sbr.rel (%p718_p7) target bundleno = 28 (0x1c), region = 48 }
  0x14   : > { %s408_s12 = scalar_lea.vmem %s975_s0, %s905_s24  ;;  %s420_s18 = scalar_lea.vmem %s976_s1, %s905_s24 }
  0x15   : > { %s432_s7 = scalar_lea.vmem %s977_s2, %s905_s24 }
  0x18   : > { %vm452_vm0 = vcmask 122880   ;;  %v807_v0 = vmov 0.0  }
  0x19   : > { %450 = vst [vmem:[%s893_s17] sm:$0x1] %v807_v0 }
  0x1a   : > { %451 = vst [vmem:[%s898_s20] sm:$0x1] %v807_v0 }
  0x1b   : > { %453 = vst.msk [vmem:[%s903_s23] sm:$0x1] %vm452_vm0, %v807_v0 }
  0x1c PF: > { %v461_v1 = vld [vmem:[%s978_s3 + $0x18] sm:$0xff]  ;;  %v460_v2 = vld [vmem:[%s978_s3 + $0x10] sm:$0xff]  ;;  %v463_v3 = vld [vmem:[%s979_s4 + $0x8] sm:$0xff]  ;;  %s722_s25 = sshll.u32 %s886_s13, 3  ;;  %v520_v4 = vlaneseq  ;;  %vm464_vm1 = vcmask 130048   ;;  %vm488_vm2 = vcmask 261120  }
  0x1d   : > { %504 = vmatpush.msra.mxu1 %v461_v1  ;;  %482 = vmatpush.msra.mxu0 %v463_v3  ;;  %v462_v5 = vld [vmem:[%s979_s4] sm:$0xff]  ;;  %v522_v6 = vstv %s722_s25  ;;  %v459_v7 = vld [vmem:[%s978_s3 + $0x8] sm:$0xff]  ;;  %vm558_vm4 = vcmask 122880  }
  0x1e   : > { %v455_v8 = vld [vmem:[%s420_s18] sm:$0xff]  ;;  %v521_v10 = vshrl.u32 %v520_v4, 7 }
  0x1f   : > { %v456_v9 = vld [vmem:[%s432_s7] sm:$0xff]  ;;  %505 = vmatpush.msra.mxu1 %v460_v2  ;;  %483 = vmatpush.msra.mxu0 %v462_v5 }
  0x20   : > { %v457_v11 = vsub.f32 %v455_v8, %v456_v9  ;;  %v458_v12 = vld [vmem:[%s978_s3] sm:$0xff]  ;;  %719 = vmatmul.msk.f32.vlgmr.msra.gmra.mxu0 %vm464_vm1, %v455_v8  ;;  %v523_v13 = vadd.s32 %v522_v6, %v521_v10 }
  0x21   : > { %506 = vmatpush.msra.mxu1 %v459_v7  ;;  %v454_v14 = vld [vmem:[%s408_s12] sm:$0xff] }
  0x22   : > { %vm524_vm3 = vcmp.lt.s32.totalorder %v523_v13, 24  ;;  %v548_v23 = vld [vmem:[%s903_s23] sm:$0x1] }
  0x23   : > { %507 = vmatpush.msra.mxu1 %v458_v12  ;;  %v528_v15 = vsel %vm524_vm3, %v457_v11, 0.0  ;;  %v766_v27 = vld [vmem:[%s980_s5] ss:$0 sm:$0xff] }
  0x24   : > { %v549_v16 = vmul.f32 %v528_v15, %v528_v15  ;;  %720 = vmatmul.msk.f32.vlgmr.msra.gmra.mxu1 %vm488_vm2, %v454_v14  ;;  %v529_v42 = vld [vmem:[%s893_s17] sm:$0x1] }
  0x25   : > { %v538_v45 = vld [vmem:[%s898_s20] sm:$0x1] }
  0x26   : > { %v550_v17 = vsel %vm464_vm1, %v549_v16, 0.0 }
  0x27   : > { %v551_v18 = vrot.slane %v550_v17, 4 }
  0x29   : > { %v552_v19 = vadd.f32 %v551_v18, %v550_v17 }
  0x2b   : > { %v553_v20 = vrot.slane %v552_v19, 2 }
  0x2d   : > { %v554_v21 = vadd.f32 %v553_v20, %v552_v19 }
  0x2f   : > { %v555_v22 = vrot.slane %v554_v21, 1 }
  0x31   : > { %v556_v24 = vadd.f32 %v555_v22, %v554_v21 }
  0x33   : > { %v557_v25 = vadd.f32 %v556_v24, %v548_v23 }
  0x35   : > { %559 = vst.msk [vmem:[%s903_s23] sm:$0x1] %vm558_vm4, %v557_v25 }
  0x9d   : > { %v485_v26 = vpop.f32.mrf.mxu0 }
  0xa1   : > { %v509_v28 = vpop.f32.mrf.mxu1 }
  0xa2   : > { %v510_v29 = vadd.f32 %v509_v28, %v485_v26 }
  0xa4   : > { %v516_v30 = vsub.f32 %v510_v29, %v766_v27 }
  0xa6   : > { %v527_v31 = vsel %vm524_vm3, %v516_v30, 0.0 }
  0xa7   : > { %v530_v32 = vrot.slane %v527_v31, 4  ;;  %v539_v33 = vmul.f32 %v527_v31, %v527_v31 }
  0xa9   : > { %v531_v34 = vadd.f32 %v530_v32, %v527_v31  ;;  %v540_v35 = vrot.slane %v539_v33, 4 }
  0xab   : > { %v532_v36 = vrot.slane %v531_v34, 2  ;;  %v541_v37 = vadd.f32 %v540_v35, %v539_v33 }
  0xad   : > { %v533_v38 = vadd.f32 %v532_v36, %v531_v34  ;;  %v542_v39 = vrot.slane %v541_v37, 2 }
  0xaf   : > { %v534_v40 = vrot.slane %v533_v38, 1  ;;  %v543_v41 = vadd.f32 %v542_v39, %v541_v37 }
  0xb1   : > { %v535_v43 = vadd.f32 %v534_v40, %v533_v38  ;;  %v544_v44 = vrot.slane %v543_v41, 1 }
  0xb3   : > { %v536_v46 = vadd.f32 %v535_v43, %v529_v42  ;;  %v545_v47 = vadd.f32 %v544_v44, %v543_v41 }
  0xb5   : > { %537 = vst [vmem:[%s893_s17] sm:$0x1] %v536_v46  ;;  %v546_v48 = vadd.f32 %v545_v47, %v538_v45 }
  0xb7   : > { %547 = vst [vmem:[%s898_s20] sm:$0x1] %v546_v48 }
  0xb8 PF: > { %s19_s9 = sadd.s32 1, %s805_s9   ;;  %s988_s27 = smov %s797_s29 }
  0xb9   : > { %p16_p8 = scmp.ge.s32.totalorder %s19_s9, 6   ;;  %s989_s28 = smov %s801_s30 }
  0xba   : > { %s990_s29 = smov %s993_s10  ;;  %s991_s30 = smov %s997_s11 }
  0xbb   :  { %18 = sbr.rel (!%p16_p8) target bundleno = 4 (0x4), region = 108 }

</bundles_post_ra>
